<compile_context>
chip_gen: v6e
topology: v6e:2x2x1
jax: 0.10.0
libtpu: 0.0.40
codegen_flags: <defaults>
</compile_context>

<pallas_src>
import jax
import jax.numpy as jnp
from jax.experimental import pallas as pl
from jax.experimental.pallas import tpu as pltpu


def _round_up(n, m):
    return ((n + m - 1) // m) * m


def _vmem_capacity_bytes():
    """Physical VMEM of the local TPU; conservative (v7x-sized) fallback."""
    try:
        return int(pltpu.get_tpu_info().vmem_capacity_bytes)
    except Exception:
        return 64 << 20


def _supports_pipeline_mode():
    """Detect BlockSpec(pipeline_mode=pl.Buffered(1)) support (narrow check)."""
    if not hasattr(pl, "Buffered"):
        return False
    try:
        pl.BlockSpec((8, 128), lambda i: (0, 0), pipeline_mode=pl.Buffered(1))
        return True
    except (TypeError, ValueError):
        return False


def _build_bias_slab(biases):
    """Concatenate (1, n) f32 biases into one lane-dense slab.

    Each segment starts at a 128-lane-aligned offset (cheap static slices in
    the kernel).  Returns (slab (1, W), tuple of (offset, width))."""
    pieces, slices, off = [], [], 0
    for b in biases:
        n = int(b.shape[1])
        slot = _round_up(n, 128)
        pieces.append(jnp.pad(b, ((0, 0), (0, slot - n))))
        slices.append((off, n))
        off += slot
    return jnp.concatenate(pieces, axis=1), tuple(slices)


def attention_autoencoder(x, params, *, tile_m=None, weights_dtype=jnp.bfloat16):
    """x: (batch, input_dim). Returns (compressed, reconstructed) in float32."""
    batch, input_dim = x.shape
    d1 = params["we1"].shape[1]
    d2 = params["we2"].shape[1]
    d3 = params["we3"].shape[1]
    compressed_dim = params["we4"].shape[1]
    comp_pad = _round_up(compressed_dim, 128)
    pad_c = comp_pad - compressed_dim
    f32 = jnp.float32

    # Fold the attention value + output projections in f32 (exact for seq_len==1).
    wvo = params["wv"].astype(f32) @ params["wo"].astype(f32)
    bvo = params["bv"].astype(f32) @ params["wo"].astype(f32) + params["bo"].astype(f32)

    # Lane-dense compressed layer: zero-pad encoder_fc4 cols / decoder_fc1 rows
    # to a multiple of 128 (mathematically exact; pad lanes stay identically 0).
    we4 = jnp.pad(params["we4"], ((0, 0), (0, pad_c)))
    be4 = jnp.pad(params["be4"], ((0, 0), (0, pad_c)))
    wd1 = jnp.pad(params["wd1"], ((0, pad_c), (0, 0)))

    weight_mats = [wvo, params["we1"], params["we2"], params["we3"], we4,
                   wd1, params["wd2"], params["wd3"], params["wd4"]]
    if weights_dtype is not None:
        # bf16 (default) weight storage; MXU still accumulates in f32 via
        # preferred_element_type. Biases stay f32.
        weight_mats = [w.astype(weights_dtype) for w in weight_mats]
    else:
        weight_mats = [w.astype(f32) for w in weight_mats]
    act_itemsize = weight_mats[0].dtype.itemsize

    biases = [bvo, params["be1"], params["be2"], params["be3"], be4,
              params["bd1"], params["bd2"], params["bd3"], params["bd4"]]
    biases = [b.astype(f32).reshape(1, -1) for b in biases]
    bias_slab, bias_slices = _build_bias_slab(biases)
    vo_s, e1_s, e2_s, e3_s, e4_s, dd1_s, dd2_s, dd3_s, dd4_s = bias_slices

    # --- generation-aware batch tiling -------------------------------------
    vmem_cap = _vmem_capacity_bytes()
    if tile_m is None:
        if vmem_cap <= (80 << 20):      # v7x-class part: 64 MiB VMEM per TC
            tile_m = 128
        elif batch >= 1024:             # v5e/v6e: fewer grid steps, weights resident
            tile_m = 512
        else:
            tile_m = 256

    padded = _round_up(batch, 8)
    if padded <= tile_m:
        tile = padded                   # single grid step for small batches
    else:
        tile = _round_up(tile_m, 8)
        padded = _round_up(batch, tile)
    if padded != batch:
        x = jnp.pad(x, ((0, padded - batch), (0, 0)))
    grid_steps = padded // tile

    # --- fused kernel -------------------------------------------------------
    def kernel(x_ref,
               wvo_ref, we1_ref, we2_ref, we3_ref, we4_ref,
               wd1_ref, wd2_ref, wd3_ref, wd4_ref,
               bias_ref, comp_ref, recon_ref):
        act_dt = wvo_ref.dtype

        def lin(h, w_ref, sl):
            off, width = sl
            w = w_ref[...]
            acc = jnp.dot(h.astype(w.dtype), w,
                          preferred_element_type=jnp.float32)
            return acc + bias_ref[:, off:off + width]

        def relu_cast(y):
            # ReLU in f32, then carry the activation in the weight dtype
            # (identical numerics to casting at the next dot; narrower spills).
            return jnp.maximum(y, 0.0).astype(act_dt)

        x_blk = x_ref[...]
        # MultiheadAttention with seq_len == 1: exactly out_proj(v_proj(x)),
        # pre-folded into one matrix in the wrapper.
        attn = lin(x_blk, wvo_ref, vo_s)

        # encoder
        h = relu_cast(lin(attn, we1_ref, e1_s))
        h = relu_cast(lin(h, we2_ref, e2_s))
        h = relu_cast(lin(h, we3_ref, e3_s))
        comp = lin(h, we4_ref, e4_s)                 # lane-dense padded width
        comp_ref[...] = comp.astype(comp_ref.dtype)

        # decoder (wd1's padded rows are zero, so pad lanes contribute 0)
        h = relu_cast(lin(comp, wd1_ref, dd1_s))
        h = relu_cast(lin(h, wd2_ref, dd2_s))
        h = relu_cast(lin(h, wd3_ref, dd3_s))
        recon_ref[...] = lin(h, wd4_ref, dd4_s).astype(recon_ref.dtype)

    use_buffered = _supports_pipeline_mode()

    def _build_and_run(single_buffer):
        resident_kwargs = (
            {"pipeline_mode": pl.Buffered(1)} if single_buffer else {}
        )
        # Constant (0,0) index_map: weights/bias slab stay VMEM-resident.
        weight_specs = [
            pl.BlockSpec(w.shape, lambda i: (0, 0), **resident_kwargs)
            for w in weight_mats
        ]
        bias_spec = pl.BlockSpec(bias_slab.shape, lambda i: (0, 0),
                                 **resident_kwargs)

        # VMEM budget: weights counted once for the single-buffered build,
        # twice for the default double-buffered fallback; plus double-buffered
        # IO tiles, chained-matmul intermediates, and Mosaic scratch headroom.
        weight_mult = 1 if single_buffer else 2
        weight_bytes = sum(int(w.size) * w.dtype.itemsize for w in weight_mats)
        bias_bytes = 8 * int(bias_slab.shape[1]) * 4     # (1,W) pads to 8 sublanes
        io_bytes = 2 * tile * (2 * input_dim + comp_pad) * 4
        inter_bytes = 2 * tile * (input_dim + d1 + d2 + d3 + comp_pad) * act_itemsize
        vmem_need = (weight_mult * (weight_bytes + bias_bytes)
                     + io_bytes + inter_bytes + (8 << 20))
        vmem_ceiling = vmem_cap - max(8 << 20, vmem_cap // 8)  # 56 MiB on v7x, 112 MiB on v5e/v6e
        vmem_limit = int(min(vmem_ceiling, max(vmem_need, 32 << 20)))

        # Single grid step: no point sharding the batch axis across cores
        # (would just duplicate the resident weight set per core on v7x).
        dims = ("arbitrary",) if grid_steps == 1 else ("parallel",)

        call = pl.pallas_call(
            kernel,
            out_shape=(
                jax.ShapeDtypeStruct((padded, comp_pad), jnp.float32),
                jax.ShapeDtypeStruct((padded, input_dim), jnp.float32),
            ),
            grid_spec=pltpu.PrefetchScalarGridSpec(
                num_scalar_prefetch=0,
                grid=(grid_steps,),
                in_specs=[pl.BlockSpec((tile, input_dim), lambda i: (i, 0))]
                + weight_specs + [bias_spec],
                out_specs=(
                    pl.BlockSpec((tile, comp_pad), lambda i: (i, 0)),
                    pl.BlockSpec((tile, input_dim), lambda i: (i, 0)),
                ),
            ),
            compiler_params=pltpu.CompilerParams(
                dimension_semantics=dims,
                vmem_limit_bytes=vmem_limit,
            ),
        )
        return call(x, *weight_mats, bias_slab)

    if use_buffered:
        try:
            comp, recon = _build_and_run(True)
        except (NotImplementedError, ValueError, pltpu.LoweringException):
            # pipeline_mode kwarg exists but Buffered(1) is rejected by this
            # Pallas/Mosaic version: default (2x) buffering, budgeted as such.
            comp, recon = _build_and_run(False)
    else:
        comp, recon = _build_and_run(False)

    return comp[:batch, :compressed_dim], recon[:batch]


def init_params(key, input_dim, compressed_dim, enc_dims):
    """Deterministic synthetic parameters (weights (in, out), biases (1, out))."""
    d1, d2, d3 = enc_dims
    layer_dims = [
        ("wv", "bv", input_dim, input_dim),       # MHA value projection
        ("wo", "bo", input_dim, input_dim),       # MHA output projection
        ("we1", "be1", input_dim, d1),
        ("we2", "be2", d1, d2),
        ("we3", "be3", d2, d3),
        ("we4", "be4", d3, compressed_dim),
        ("wd1", "bd1", compressed_dim, d3),
        ("wd2", "bd2", d3, d2),
        ("wd3", "bd3", d2, d1),
        ("wd4", "bd4", d1, input_dim),
    ]
    params = {}
    keys = jax.random.split(key, len(layer_dims))
    for k, (wname, bname, fan_in, fan_out) in zip(keys, layer_dims):
        kw, kb = jax.random.split(k)
        bound = 1.0 / jnp.sqrt(fan_in)
        params[wname] = jax.random.uniform(
            kw, (fan_in, fan_out), jnp.float32, -bound, bound)
        params[bname] = jax.random.uniform(
            kb, (1, fan_out), jnp.float32, -bound, bound)
    return params


def reference_forward(x, params, weights_dtype=None):
    """Pure-JAX reference.

    weights_dtype=None: exact f32 PyTorch semantics (unfolded attention).
    weights_dtype=bf16: mimics the kernel numerics (f32 fold, weight cast,
    f32 MXU accumulation) for a tight comparison."""
    def lin(h, w, b):
        if weights_dtype is not None:
            h = h.astype(weights_dtype)
            w = w.astype(weights_dtype)
        return jnp.dot(h, w, preferred_element_type=jnp.float32) + b

    if weights_dtype is None:
        a = lin(lin(x, params["wv"], params["bv"]), params["wo"], params["bo"])
    else:
        wvo = params["wv"] @ params["wo"]
        bvo = params["bv"] @ params["wo"] + params["bo"]
        a = lin(x, wvo, bvo)
    h = jax.nn.relu(lin(a, params["we1"], params["be1"]))
    h = jax.nn.relu(lin(h, params["we2"], params["be2"]))
    h = jax.nn.relu(lin(h, params["we3"], params["be3"]))
    comp = lin(h, params["we4"], params["be4"])
    h = jax.nn.relu(lin(comp, params["wd1"], params["bd1"]))
    h = jax.nn.relu(lin(h, params["wd2"], params["bd2"]))
    h = jax.nn.relu(lin(h, params["wd3"], params["bd3"]))
    recon = lin(h, params["wd4"], params["bd4"])
    return comp, recon


if __name__ == "__main__":
    # Small shapes consistent with the module (scaled from 3072/2048/1024/512/300).
    batch = 16
    input_dim = 256
    compressed_dim = 40          # intentionally not a multiple of 128 (like 300)
    enc_dims = (128, 96, 64)     # encoder_fc1/2/3 output dims (scaled)
    # num_heads = 8: with seq_len == 1 the head split is identity on channels.

    key = jax.random.PRNGKey(0)
    kx, kp = jax.random.split(key)
    x = jax.random.normal(kx, (batch, input_dim), jnp.float32)
    params = init_params(kp, input_dim, compressed_dim, enc_dims)

    # Production config: bf16 weight storage (default), f32 MXU accumulation.
    comp, recon = attention_autoencoder(x, params)
    jax.block_until_ready((comp, recon))

    assert comp.shape == (batch, compressed_dim)
    assert recon.shape == (batch, input_dim)

    # Tight check vs a numerics-matched reference (same bf16 weights, f32 acc).
    comp_m, recon_m = reference_forward(x, params, weights_dtype=jnp.bfloat16)
    assert jnp.allclose(comp, comp_m, atol=1e-2, rtol=1e-2)
    assert jnp.allclose(recon, recon_m, atol=1e-2, rtol=1e-2)

    # Semantic check vs the exact f32 PyTorch-equivalent reference
    # (tolerance scaled for bf16 weight storage).
    comp_f, recon_f = reference_forward(x, params)
    assert jnp.allclose(comp, comp_f, atol=5e-2, rtol=5e-2)
    assert jnp.allclose(recon, recon_f, atol=5e-2, rtol=5e-2)

    print("KERNEL_OK")
</pallas_src>

<mosaic_0001>
module attributes {stable_mosaic.version = 11 : i64} {
  func.func @kernel(%arg0: i32, %arg1: memref<16x256xf32, #tpu.memory_space<vmem>>, %arg2: memref<256x256xbf16, #tpu.memory_space<vmem>>, %arg3: memref<256x128xbf16, #tpu.memory_space<vmem>>, %arg4: memref<128x96xbf16, #tpu.memory_space<vmem>>, %arg5: memref<96x64xbf16, #tpu.memory_space<vmem>>, %arg6: memref<64x128xbf16, #tpu.memory_space<vmem>>, %arg7: memref<128x64xbf16, #tpu.memory_space<vmem>>, %arg8: memref<64x96xbf16, #tpu.memory_space<vmem>>, %arg9: memref<96x128xbf16, #tpu.memory_space<vmem>>, %arg10: memref<128x256xbf16, #tpu.memory_space<vmem>>, %arg11: memref<1x1408xf32, #tpu.memory_space<vmem>>, %arg12: memref<16x128xf32, #tpu.memory_space<vmem>>, %arg13: memref<16x256xf32, #tpu.memory_space<vmem>>) attributes {dimension_semantics = [#tpu.dimension_semantics<arbitrary>], iteration_bounds = array<i64: 1>, scalar_prefetch = 0 : i64, scratch_operands = 0 : i64, tpu.core_type = #tpu.core_type<tc>, window_params = [{transform_indices = @transform_0, window_bounds = array<i64: 16, 256>}, {pipeline_mode = #tpu.pipeline_mode<synchronous>, transform_indices = @transform_1, window_bounds = array<i64: 256, 256>}, {pipeline_mode = #tpu.pipeline_mode<synchronous>, transform_indices = @transform_2, window_bounds = array<i64: 256, 128>}, {pipeline_mode = #tpu.pipeline_mode<synchronous>, transform_indices = @transform_3, window_bounds = array<i64: 128, 96>}, {pipeline_mode = #tpu.pipeline_mode<synchronous>, transform_indices = @transform_4, window_bounds = array<i64: 96, 64>}, {pipeline_mode = #tpu.pipeline_mode<synchronous>, transform_indices = @transform_5, window_bounds = array<i64: 64, 128>}, {pipeline_mode = #tpu.pipeline_mode<synchronous>, transform_indices = @transform_6, window_bounds = array<i64: 128, 64>}, {pipeline_mode = #tpu.pipeline_mode<synchronous>, transform_indices = @transform_7, window_bounds = array<i64: 64, 96>}, {pipeline_mode = #tpu.pipeline_mode<synchronous>, transform_indices = @transform_8, window_bounds = array<i64: 96, 128>}, {pipeline_mode = #tpu.pipeline_mode<synchronous>, transform_indices = @transform_9, window_bounds = array<i64: 128, 256>}, {pipeline_mode = #tpu.pipeline_mode<synchronous>, transform_indices = @transform_10, window_bounds = array<i64: 1, 1408>}, {transform_indices = @transform_11, window_bounds = array<i64: 16, 128>}, {transform_indices = @transform_12, window_bounds = array<i64: 16, 256>}]} {
    %c0 = arith.constant 0 : index
    %c0_0 = arith.constant 0 : index
    %0 = vector.load %arg1[%c0, %c0_0] : memref<16x256xf32, #tpu.memory_space<vmem>>, vector<16x256xf32>
    %c0_1 = arith.constant 0 : index
    %c0_2 = arith.constant 0 : index
    %1 = vector.load %arg2[%c0_1, %c0_2] : memref<256x256xbf16, #tpu.memory_space<vmem>>, vector<256x256xbf16>
    %2 = arith.truncf %0 : vector<16x256xf32> to vector<16x256xbf16>
    %cst = arith.constant dense<0.000000e+00> : vector<16x256xf32>
    %3 = tpu.matmul %2, %1, %cst {dimension_numbers = #tpu.dot_dimension_numbers<[1], [0], [0], [1], [0, 0, 1, 1], [], []>} : vector<16x256xbf16>, vector<256x256xbf16>, vector<16x256xf32> -> vector<16x256xf32>
    %c0_3 = arith.constant 0 : index
    %c0_4 = arith.constant 0 : index
    %4 = vector.load %arg11[%c0_3, %c0_4] : memref<1x1408xf32, #tpu.memory_space<vmem>>, vector<1x256xf32>
    %5 = vector.broadcast %4 : vector<1x256xf32> to vector<16x256xf32>
    %6 = arith.addf %3, %5 : vector<16x256xf32>
    %c0_5 = arith.constant 0 : index
    %c0_6 = arith.constant 0 : index
    %7 = vector.load %arg3[%c0_5, %c0_6] : memref<256x128xbf16, #tpu.memory_space<vmem>>, vector<256x128xbf16>
    %8 = arith.truncf %6 : vector<16x256xf32> to vector<16x256xbf16>
    %cst_7 = arith.constant dense<0.000000e+00> : vector<16x128xf32>
    %9 = tpu.matmul %8, %7, %cst_7 {dimension_numbers = #tpu.dot_dimension_numbers<[1], [0], [0], [1], [0, 0, 1, 1], [], []>} : vector<16x256xbf16>, vector<256x128xbf16>, vector<16x128xf32> -> vector<16x128xf32>
    %c0_8 = arith.constant 0 : index
    %c256 = arith.constant 256 : index
    %10 = vector.load %arg11[%c0_8, %c256] : memref<1x1408xf32, #tpu.memory_space<vmem>>, vector<1x128xf32>
    %11 = vector.broadcast %10 : vector<1x128xf32> to vector<16x128xf32>
    %12 = arith.addf %9, %11 : vector<16x128xf32>
    %cst_9 = arith.constant 0.000000e+00 : f32
    %13 = vector.broadcast %cst_9 : f32 to vector<16x128xf32>
    %14 = arith.maximumf %12, %13 : vector<16x128xf32>
    %15 = arith.truncf %14 : vector<16x128xf32> to vector<16x128xbf16>
    %c0_10 = arith.constant 0 : index
    %c0_11 = arith.constant 0 : index
    %16 = vector.load %arg4[%c0_10, %c0_11] : memref<128x96xbf16, #tpu.memory_space<vmem>>, vector<128x96xbf16>
    %cst_12 = arith.constant dense<0.000000e+00> : vector<16x96xf32>
    %17 = tpu.matmul %15, %16, %cst_12 {dimension_numbers = #tpu.dot_dimension_numbers<[1], [0], [0], [1], [0, 0, 1, 1], [], []>} : vector<16x128xbf16>, vector<128x96xbf16>, vector<16x96xf32> -> vector<16x96xf32>
    %c0_13 = arith.constant 0 : index
    %c384 = arith.constant 384 : index
    %18 = vector.load %arg11[%c0_13, %c384] : memref<1x1408xf32, #tpu.memory_space<vmem>>, vector<1x96xf32>
    %19 = vector.broadcast %18 : vector<1x96xf32> to vector<16x96xf32>
    %20 = arith.addf %17, %19 : vector<16x96xf32>
    %cst_14 = arith.constant 0.000000e+00 : f32
    %21 = vector.broadcast %cst_14 : f32 to vector<16x96xf32>
    %22 = arith.maximumf %20, %21 : vector<16x96xf32>
    %23 = arith.truncf %22 : vector<16x96xf32> to vector<16x96xbf16>
    %c0_15 = arith.constant 0 : index
    %c0_16 = arith.constant 0 : index
    %24 = vector.load %arg5[%c0_15, %c0_16] : memref<96x64xbf16, #tpu.memory_space<vmem>>, vector<96x64xbf16>
    %cst_17 = arith.constant dense<0.000000e+00> : vector<16x64xf32>
    %25 = tpu.matmul %23, %24, %cst_17 {dimension_numbers = #tpu.dot_dimension_numbers<[1], [0], [0], [1], [0, 0, 1, 1], [], []>} : vector<16x96xbf16>, vector<96x64xbf16>, vector<16x64xf32> -> vector<16x64xf32>
    %c0_18 = arith.constant 0 : index
    %c512 = arith.constant 512 : index
    %26 = vector.load %arg11[%c0_18, %c512] : memref<1x1408xf32, #tpu.memory_space<vmem>>, vector<1x64xf32>
    %27 = vector.broadcast %26 : vector<1x64xf32> to vector<16x64xf32>
    %28 = arith.addf %25, %27 : vector<16x64xf32>
    %cst_19 = arith.constant 0.000000e+00 : f32
    %29 = vector.broadcast %cst_19 : f32 to vector<16x64xf32>
    %30 = arith.maximumf %28, %29 : vector<16x64xf32>
    %31 = arith.truncf %30 : vector<16x64xf32> to vector<16x64xbf16>
    %c0_20 = arith.constant 0 : index
    %c0_21 = arith.constant 0 : index
    %32 = vector.load %arg6[%c0_20, %c0_21] : memref<64x128xbf16, #tpu.memory_space<vmem>>, vector<64x128xbf16>
    %cst_22 = arith.constant dense<0.000000e+00> : vector<16x128xf32>
    %33 = tpu.matmul %31, %32, %cst_22 {dimension_numbers = #tpu.dot_dimension_numbers<[1], [0], [0], [1], [0, 0, 1, 1], [], []>} : vector<16x64xbf16>, vector<64x128xbf16>, vector<16x128xf32> -> vector<16x128xf32>
    %c0_23 = arith.constant 0 : index
    %c640 = arith.constant 640 : index
    %34 = vector.load %arg11[%c0_23, %c640] : memref<1x1408xf32, #tpu.memory_space<vmem>>, vector<1x128xf32>
    %35 = vector.broadcast %34 : vector<1x128xf32> to vector<16x128xf32>
    %36 = arith.addf %33, %35 : vector<16x128xf32>
    %c0_24 = arith.constant 0 : index
    %c0_25 = arith.constant 0 : index
    %37 = vector.load %arg12[%c0_24, %c0_25] : memref<16x128xf32, #tpu.memory_space<vmem>>, vector<16x128xf32>
    tpu.vector_store %arg12[%c0_24, %c0_25], %36 {strides = array<i32>} : memref<16x128xf32, #tpu.memory_space<vmem>>, vector<16x128xf32>,
    %c0_26 = arith.constant 0 : index
    %c0_27 = arith.constant 0 : index
    %38 = vector.load %arg7[%c0_26, %c0_27] : memref<128x64xbf16, #tpu.memory_space<vmem>>, vector<128x64xbf16>
    %39 = arith.truncf %36 : vector<16x128xf32> to vector<16x128xbf16>
    %cst_28 = arith.constant dense<0.000000e+00> : vector<16x64xf32>
    %40 = tpu.matmul %39, %38, %cst_28 {dimension_numbers = #tpu.dot_dimension_numbers<[1], [0], [0], [1], [0, 0, 1, 1], [], []>} : vector<16x128xbf16>, vector<128x64xbf16>, vector<16x64xf32> -> vector<16x64xf32>
    %c0_29 = arith.constant 0 : index
    %c768 = arith.constant 768 : index
    %41 = vector.load %arg11[%c0_29, %c768] : memref<1x1408xf32, #tpu.memory_space<vmem>>, vector<1x64xf32>
    %42 = vector.broadcast %41 : vector<1x64xf32> to vector<16x64xf32>
    %43 = arith.addf %40, %42 : vector<16x64xf32>
    %cst_30 = arith.constant 0.000000e+00 : f32
    %44 = vector.broadcast %cst_30 : f32 to vector<16x64xf32>
    %45 = arith.maximumf %43, %44 : vector<16x64xf32>
    %46 = arith.truncf %45 : vector<16x64xf32> to vector<16x64xbf16>
    %c0_31 = arith.constant 0 : index
    %c0_32 = arith.constant 0 : index
    %47 = vector.load %arg8[%c0_31, %c0_32] : memref<64x96xbf16, #tpu.memory_space<vmem>>, vector<64x96xbf16>
    %cst_33 = arith.constant dense<0.000000e+00> : vector<16x96xf32>
    %48 = tpu.matmul %46, %47, %cst_33 {dimension_numbers = #tpu.dot_dimension_numbers<[1], [0], [0], [1], [0, 0, 1, 1], [], []>} : vector<16x64xbf16>, vector<64x96xbf16>, vector<16x96xf32> -> vector<16x96xf32>
    %c0_34 = arith.constant 0 : index
    %c896 = arith.constant 896 : index
    %49 = vector.load %arg11[%c0_34, %c896] : memref<1x1408xf32, #tpu.memory_space<vmem>>, vector<1x96xf32>
    %50 = vector.broadcast %49 : vector<1x96xf32> to vector<16x96xf32>
    %51 = arith.addf %48, %50 : vector<16x96xf32>
    %cst_35 = arith.constant 0.000000e+00 : f32
    %52 = vector.broadcast %cst_35 : f32 to vector<16x96xf32>
    %53 = arith.maximumf %51, %52 : vector<16x96xf32>
    %54 = arith.truncf %53 : vector<16x96xf32> to vector<16x96xbf16>
    %c0_36 = arith.constant 0 : index
    %c0_37 = arith.constant 0 : index
    %55 = vector.load %arg9[%c0_36, %c0_37] : memref<96x128xbf16, #tpu.memory_space<vmem>>, vector<96x128xbf16>
    %cst_38 = arith.constant dense<0.000000e+00> : vector<16x128xf32>
    %56 = tpu.matmul %54, %55, %cst_38 {dimension_numbers = #tpu.dot_dimension_numbers<[1], [0], [0], [1], [0, 0, 1, 1], [], []>} : vector<16x96xbf16>, vector<96x128xbf16>, vector<16x128xf32> -> vector<16x128xf32>
    %c0_39 = arith.constant 0 : index
    %c1024 = arith.constant 1024 : index
    %57 = vector.load %arg11[%c0_39, %c1024] : memref<1x1408xf32, #tpu.memory_space<vmem>>, vector<1x128xf32>
    %58 = vector.broadcast %57 : vector<1x128xf32> to vector<16x128xf32>
    %59 = arith.addf %56, %58 : vector<16x128xf32>
    %cst_40 = arith.constant 0.000000e+00 : f32
    %60 = vector.broadcast %cst_40 : f32 to vector<16x128xf32>
    %61 = arith.maximumf %59, %60 : vector<16x128xf32>
    %62 = arith.truncf %61 : vector<16x128xf32> to vector<16x128xbf16>
    %c0_41 = arith.constant 0 : index
    %c0_42 = arith.constant 0 : index
    %63 = vector.load %arg10[%c0_41, %c0_42] : memref<128x256xbf16, #tpu.memory_space<vmem>>, vector<128x256xbf16>
    %cst_43 = arith.constant dense<0.000000e+00> : vector<16x256xf32>
    %64 = tpu.matmul %62, %63, %cst_43 {dimension_numbers = #tpu.dot_dimension_numbers<[1], [0], [0], [1], [0, 0, 1, 1], [], []>} : vector<16x128xbf16>, vector<128x256xbf16>, vector<16x256xf32> -> vector<16x256xf32>
    %c0_44 = arith.constant 0 : index
    %c1152 = arith.constant 1152 : index
    %65 = vector.load %arg11[%c0_44, %c1152] : memref<1x1408xf32, #tpu.memory_space<vmem>>, vector<1x256xf32>
    %66 = vector.broadcast %65 : vector<1x256xf32> to vector<16x256xf32>
    %67 = arith.addf %64, %66 : vector<16x256xf32>
    %c0_45 = arith.constant 0 : index
    %c0_46 = arith.constant 0 : index
    %68 = vector.load %arg13[%c0_45, %c0_46] : memref<16x256xf32, #tpu.memory_space<vmem>>, vector<16x256xf32>
    tpu.vector_store %arg13[%c0_45, %c0_46], %67 {strides = array<i32>} : memref<16x256xf32, #tpu.memory_space<vmem>>, vector<16x256xf32>,
    return
  }
  func.func @transform_0(%arg0: i32) -> (i32, i32) {
    %c0_i32 = arith.constant 0 : i32
    %c0_i32_0 = arith.constant 0 : i32
    return %arg0, %c0_i32 : i32, i32
  }
  func.func @transform_1(%arg0: i32) -> (i32, i32) {
    %c0_i32 = arith.constant 0 : i32
    %c0_i32_0 = arith.constant 0 : i32
    %c0_i32_1 = arith.constant 0 : i32
    return %c0_i32, %c0_i32_0 : i32, i32
  }
  func.func @transform_2(%arg0: i32) -> (i32, i32) {
    %c0_i32 = arith.constant 0 : i32
    %c0_i32_0 = arith.constant 0 : i32
    %c0_i32_1 = arith.constant 0 : i32
    return %c0_i32, %c0_i32_0 : i32, i32
  }
  func.func @transform_3(%arg0: i32) -> (i32, i32) {
    %c0_i32 = arith.constant 0 : i32
    %c0_i32_0 = arith.constant 0 : i32
    %c0_i32_1 = arith.constant 0 : i32
    return %c0_i32, %c0_i32_0 : i32, i32
  }
  func.func @transform_4(%arg0: i32) -> (i32, i32) {
    %c0_i32 = arith.constant 0 : i32
    %c0_i32_0 = arith.constant 0 : i32
    %c0_i32_1 = arith.constant 0 : i32
    return %c0_i32, %c0_i32_0 : i32, i32
  }
  func.func @transform_5(%arg0: i32) -> (i32, i32) {
    %c0_i32 = arith.constant 0 : i32
    %c0_i32_0 = arith.constant 0 : i32
    %c0_i32_1 = arith.constant 0 : i32
    return %c0_i32, %c0_i32_0 : i32, i32
  }
  func.func @transform_6(%arg0: i32) -> (i32, i32) {
    %c0_i32 = arith.constant 0 : i32
    %c0_i32_0 = arith.constant 0 : i32
    %c0_i32_1 = arith.constant 0 : i32
    return %c0_i32, %c0_i32_0 : i32, i32
  }
  func.func @transform_7(%arg0: i32) -> (i32, i32) {
    %c0_i32 = arith.constant 0 : i32
    %c0_i32_0 = arith.constant 0 : i32
    %c0_i32_1 = arith.constant 0 : i32
    return %c0_i32, %c0_i32_0 : i32, i32
  }
  func.func @transform_8(%arg0: i32) -> (i32, i32) {
    %c0_i32 = arith.constant 0 : i32
    %c0_i32_0 = arith.constant 0 : i32
    %c0_i32_1 = arith.constant 0 : i32
    return %c0_i32, %c0_i32_0 : i32, i32
  }
  func.func @transform_9(%arg0: i32) -> (i32, i32) {
    %c0_i32 = arith.constant 0 : i32
    %c0_i32_0 = arith.constant 0 : i32
    %c0_i32_1 = arith.constant 0 : i32
    return %c0_i32, %c0_i32_0 : i32, i32
  }
  func.func @transform_10(%arg0: i32) -> (i32, i32) {
    %c0_i32 = arith.constant 0 : i32
    %c0_i32_0 = arith.constant 0 : i32
    %c0_i32_1 = arith.constant 0 : i32
    return %c0_i32, %c0_i32_0 : i32, i32
  }
  func.func @transform_11(%arg0: i32) -> (i32, i32) {
    %c0_i32 = arith.constant 0 : i32
    %c0_i32_0 = arith.constant 0 : i32
    return %arg0, %c0_i32 : i32, i32
  }
  func.func @transform_12(%arg0: i32) -> (i32, i32) {
    %c0_i32 = arith.constant 0 : i32
    %c0_i32_0 = arith.constant 0 : i32
    return %arg0, %c0_i32 : i32, i32
  }
}

</mosaic_0001>

<bundles_post_ra>
// kernel: tpu_custom_call.1
= control target key start
LH: loop header
LB: loop body
LE: loop exit
PB: predicated region body
PF: predicated region fallthrough
CT: control target
= control target key end

     0   :  { %18 = vsyncpa [#allocation3], 0  ;;  %s2325_s0 = inlined_call_operand.hbm [shape: f32[16,256], index: 0, kind: input, shape index: {}]   ;;  %s2326_s1 = inlined_call_operand.vmem [shape: bf16[256,256], index: 1, kind: input, shape index: {}]   ;;  %s2327_s2 = inlined_call_operand.hbm [shape: bf16[256,128], index: 2, kind: input, shape index: {}]   ;;  %s2328_s3 = inlined_call_operand.vmem [shape: bf16[128,96], index: 3, kind: input, shape index: {}]   ;;  %s2329_s4 = inlined_call_operand.vmem [shape: bf16[96,64], index: 4, kind: input, shape index: {}]   ;;  %s2330_s5 = inlined_call_operand.hbm [shape: bf16[64,128], index: 5, kind: input, shape index: {}]   ;;  %s2331_s6 = inlined_call_operand.vmem [shape: bf16[128,64], index: 6, kind: input, shape index: {}]   ;;  %s2332_s7 = inlined_call_operand.hbm [shape: bf16[64,96], index: 7, kind: input, shape index: {}]   ;;  %s2333_s8 = inlined_call_operand.hbm [shape: bf16[96,128], index: 8, kind: input, shape index: {}]   ;;  %s2334_s9 = inlined_call_operand.hbm [shape: bf16[128,256], index: 9, kind: input, shape index: {}]   ;;  %s2335_s10 = inlined_call_operand.vmem [shape: f32[1,1408], index: 10, kind: input, shape index: {}]   ;;  %s2336_s11 = inlined_call_operand.hbm [shape: f32[16,128], index: 11, kind: output, shape index: {0}]   ;;  %s2337_s12 = inlined_call_operand.hbm [shape: f32[16,256], index: 12, kind: output, shape index: {1}]  }
   0x1   :  { %19 = vsyncpa [#allocation6], 0 }
   0x2   :  { %20 = vsyncpa [#allocation9], 0 }
   0x3   :  { %21 = vsyncpa [#allocation12], 0 }
   0x4   :  { %22 = vsyncpa [#allocation4], 0 }
   0x5   :  { %23 = vsyncpa [#allocation15], 0  ;;  %s1942_s21 = smov [#allocation5]  }
   0x6   :  { %s43_s22 = sshll.u32 %s1942_s21, 4  ;;  %s44_s22 = int_to_ptr.vmem [resolvable:$true] %s43_s22 }
   0x7   :  { %s1778_s23 = scalar_lea.vmem %s44_s22, 2048  ;;  %p1783_p1 = scmp.lt.s32.totalorder %s44_s22, %s44_s22 }
   0x8   :  { %p1779_p0 = scmp.ne.s32.totalorder %s44_s22, %s1778_s23  ;;  %p1784_p2 = scmp.lt.s32.totalorder %s1778_s23, %s1778_s23 }
   0xa   :  { %p1785_p3 = por %p1784_p2, %p1783_p1 }
   0xc   :  { %p1786_p4 = pnand %p1785_p3, %p1779_p0 }
   0xe   :  { %1789 = shalt.err (!%p1786_p4)
}
   0xf   :  { %s1943_s24 = smov 64   ;;  %s1944_s25 = smov 4  }
  0x10   :  { %49 = dma.hbm_to_vmem [thread:$0]  %s2327_s2, 2048, %s44_s22, [#allocation6], %s1943_s24, %s1943_s24, %s1944_s25  }
  0x11   :  { %s1945_s28 = smov [#allocation8]   ;;  %s1946_s30 = smov [#allocation2]  }
  0x12   :  { %s73_s29 = sshll.u32 %s1945_s28, 4  ;;  %s29_s13 = sshll.u32 %s1946_s30, 4  ;;  %s74_s29 = int_to_ptr.vmem [resolvable:$true] %s73_s29  ;;  %s30_s13 = int_to_ptr.vmem [resolvable:$true] %s29_s13 }
  0x13   :  { %s1798_s14 = scalar_lea.vmem %s74_s29, 512  ;;  %p1803_p6 = scmp.lt.s32.totalorder %s74_s29, %s74_s29 }
  0x14   :  { %p1799_p5 = scmp.ne.s32.totalorder %s74_s29, %s1798_s14  ;;  %p1804_p7 = scmp.lt.s32.totalorder %s1798_s14, %s1798_s14 }
  0x16   :  { %p1805_p8 = por %p1804_p7, %p1803_p6 }
  0x18   :  { %p1806_p9 = pnand %p1805_p8, %p1799_p5 }
  0x1a   :  { %1809 = shalt.err (!%p1806_p9)
}
  0x1b   :  { %79 = dma.hbm_to_vmem [thread:$0]  %s2332_s7, 512, %s74_s29, [#allocation9], %s1943_s24, %s1943_s24, %s1944_s25  }
  0x1c   :  { %s1818_s2 = scalar_lea.vmem %s30_s13, 512  ;;  %p1823_p11 = scmp.lt.s32.totalorder %s30_s13, %s30_s13 }
  0x1d   :  { %p1819_p10 = scmp.ne.s32.totalorder %s30_s13, %s1818_s2  ;;  %p1824_p12 = scmp.lt.s32.totalorder %s1818_s2, %s1818_s2 }
  0x1f   :  { %p1825_p13 = por %p1824_p12, %p1823_p11 }
  0x21   :  { %p1826_p0 = pnand %p1825_p13, %p1819_p10 }
  0x23   :  { %1829 = shalt.err (!%p1826_p0)
}
  0x24   :  { %s1947_s17 = smov 256   ;;  %s1948_s18 = smov 16  }
  0x25   :  { %35 = dma.hbm_to_vmem [thread:$0]  %s2325_s0, 512, %s30_s13, [#allocation3], %s1947_s17, %s1947_s17, %s1948_s18  }
  0x26   :  { %s1949_s21 = smov [#allocation7]   ;;  %s1950_s7 = smov [#allocation10]  }
  0x27   :  { %s59_s22 = sshll.u32 %s1949_s21, 4  ;;  %s85_s23 = sshll.u32 %s1950_s7, 4  ;;  %s60_s22 = int_to_ptr.vmem [resolvable:$true] %s59_s22  ;;  %s86_s23 = int_to_ptr.vmem [resolvable:$true] %s85_s23 }
  0x28   :  { %s1838_s26 = scalar_lea.vmem %s60_s22, 512  ;;  %p1843_p2 = scmp.lt.s32.totalorder %s60_s22, %s60_s22 }
  0x29   :  { %p1839_p1 = scmp.ne.s32.totalorder %s60_s22, %s1838_s26  ;;  %p1844_p3 = scmp.lt.s32.totalorder %s1838_s26, %s1838_s26 }
  0x2b   :  { %p1845_p4 = por %p1844_p3, %p1843_p2 }
  0x2d   :  { %p1846_p5 = pnand %p1845_p4, %p1839_p1 }
  0x2f   :  { %1849 = shalt.err (!%p1846_p5)
}
  0x30   :  { %65 = dma.hbm_to_vmem [thread:$0]  %s2330_s5, 512, %s60_s22, [#allocation6], %s1943_s24, %s1943_s24, %s1944_s25  }
  0x31   :  { %s1858_s0 = scalar_lea.vmem %s86_s23, 768  ;;  %p1863_p7 = scmp.lt.s32.totalorder %s86_s23, %s86_s23 }
  0x32   :  { %p1859_p6 = scmp.ne.s32.totalorder %s86_s23, %s1858_s0  ;;  %p1864_p8 = scmp.lt.s32.totalorder %s1858_s0, %s1858_s0 }
  0x34   :  { %p1865_p9 = por %p1864_p8, %p1863_p7 }
  0x36   :  { %p1866_p10 = pnand %p1865_p9, %p1859_p6 }
  0x38   :  { %1869 = shalt.err (!%p1866_p10)
}
  0x39   :  { %91 = dma.hbm_to_vmem [thread:$0]  %s2333_s8, 768, %s86_s23, [#allocation9], %s1943_s24, %s1943_s24, %s1944_s25  }
  0x3a   :  { %s1951_s13 = smov [#allocation11]  }
  0x3b   :  { %s97_s14 = sshll.u32 %s1951_s13, 4  ;;  %s98_s14 = int_to_ptr.vmem [resolvable:$true] %s97_s14 }
  0x3c   :  { %s1878_s15 = scalar_lea.vmem %s98_s14, 2048  ;;  %p1883_p12 = scmp.lt.s32.totalorder %s98_s14, %s98_s14 }
  0x3d   :  { %p1879_p11 = scmp.ne.s32.totalorder %s98_s14, %s1878_s15  ;;  %p1884_p13 = scmp.lt.s32.totalorder %s1878_s15, %s1878_s15 }
  0x3f   :  { %p1885_p0 = por %p1884_p13, %p1883_p12 }
  0x41   :  { %p1886_p1 = pnand %p1885_p0, %p1879_p11 }
  0x43   :  { %1889 = shalt.err (!%p1886_p1)
}
  0x44   :  { %s1952_s5 = smov 128   ;;  %s1953_s16 = smov 8  }
  0x45   :  { %103 = dma.hbm_to_vmem [thread:$0]  %s2334_s9, 2048, %s98_s14, [#allocation12], %s1952_s5, %s1952_s5, %s1953_s16  }
  0x46   :  { %1930 = dma.done.wait [#allocation3], 512  }
  0x47   :  { %1931 = vsyncadd [#allocation3], 4294966784 }
  0x48   :  { %1932 = dma.done.wait [#allocation6], 2560  }
  0x49   :  { %1933 = vsyncadd [#allocation6], 4294964736 }
  0x4a   :  { %1934 = dma.done.wait [#allocation9], 1280  }
  0x4b   :  { %1935 = vsyncadd [#allocation9], 4294966016 }
  0x4c   :  { %1936 = dma.done.wait [#allocation12], 2048  }
  0x4d   :  { %1937 = vsyncadd [#allocation12], 4294965248  ;;  %v1646_v0 = vld [vmem:[%s2326_s1 + $0x74] ss:$8 sps:$4 sm:$0xff]   ;;  %v1648_v1 = vld [vmem:[%s2326_s1 + $0x70] ss:$8 sps:$4 sm:$0xff]   ;;  %v165_v55 = vlaneseq }
  0x4e   :  { %335 = vmatprep.subr.bf16.mxu0 %v1646_v0  ;;  %v1649_v2 = vld [vmem:[%s2326_s1 + $0x64] ss:$8 sps:$4 sm:$0xff]   ;;  %v1651_v3 = vld [vmem:[%s2326_s1 + $0x60] ss:$8 sps:$4 sm:$0xff]   ;;  %v1652_v4 = vld [vmem:[%s2326_s1 + $0x54] ss:$8 sps:$4 sm:$0xff]  }
  0x4f   :  { %336 = vmatpush1.bf16.msra.mxu0 %v1648_v1  ;;  %v1654_v5 = vld [vmem:[%s2326_s1 + $0x50] ss:$8 sps:$4 sm:$0xff]   ;;  %v1655_v6 = vld [vmem:[%s2326_s1 + $0x44] ss:$8 sps:$4 sm:$0xff]   ;;  %v1657_v7 = vld [vmem:[%s2326_s1 + $0x40] ss:$8 sps:$4 sm:$0xff]  }
  0x50   :  { %337 = vmatprep.subr.bf16.mxu0 %v1649_v2  ;;  %v1658_v8 = vld [vmem:[%s2326_s1 + $0x34] ss:$8 sps:$4 sm:$0xff]   ;;  %v1660_v9 = vld [vmem:[%s2326_s1 + $0x30] ss:$8 sps:$4 sm:$0xff]   ;;  %v1661_v10 = vld [vmem:[%s2326_s1 + $0x24] ss:$8 sps:$4 sm:$0xff]  }
  0x51   :  { %v1663_v11 = vld [vmem:[%s2326_s1 + $0x20] ss:$8 sps:$4 sm:$0xff]   ;;  %v1664_v12 = vld [vmem:[%s2326_s1 + $0x14] ss:$8 sps:$4 sm:$0xff]   ;;  %v1666_v15 = vld [vmem:[%s2326_s1 + $0x10] ss:$8 sps:$4 sm:$0xff]  }
  0x52   :  { %v126_v13 = vld [vmem:[#allocation2 + $0x8] sm:$0xff]  ;;  %v128_v14 = vld [vmem:[#allocation2 + $0x18] sm:$0xff]  ;;  %v1696_v21 = vld [vmem:[#allocation5 + $0x70] sm:$0xff]   ;;  %v1954_v54 = vmov 0.0   ;;  %v2158_v56 = vshrl.u32 %v165_v55, 7  ;;  %vm1955_vm0 = vmmov 0  }
  0x53   :  { %338 = vmatpush1.bf16.msra.mxu0 %v1651_v3  ;;  %v1667_v16 = vld [vmem:[%s2326_s1 + $0x4] ss:$8 sps:$4 sm:$0xff]   ;;  %v162_v17 = vpack.c.bf16 %v128_v14, %v126_v13  ;;  %v1694_v18 = vld [vmem:[#allocation5 + $0x78] sm:$0xff]   ;;  %v1669_v20 = vld [vmem:[%s2326_s1] ss:$8 sps:$4 sm:$0xff]   ;;  %vm729_vm1 = vcmask 785408  }
  0x54   :  { %339 = vmatprep.subr.bf16.mxu0 %v1652_v4  ;;  %v1695_v19 = vld [vmem:[#allocation5 + $0x38] sm:$0xff]   ;;  %1469 = vmatprep.subr.bf16.mxu1 %v1694_v18  ;;  %v1697_v22 = vld [vmem:[#allocation5 + $0x30] sm:$0xff]   ;;  %v1698_v23 = vld [vmem:[#allocation5 + $0x68] sm:$0xff]   ;;  %v171_v57 = vsub.s32 1, %v2158_v56  ;;  %v167_v58 = vsub.s32 0, %v2158_v56  ;;  %vm816_vm2 = vcmask 523264  }
  0x55   :  { %367 = vmatprep.mubr.bf16.mxu0 %v162_v17  ;;  %1470 = vmatpush3.bf16.msra.mxu1 %v1695_v19  ;;  %v1670_v24 = vld [vmem:[%s2326_s1 + $0xf4] ss:$8 sps:$4 sm:$0xff]   ;;  %v1672_v25 = vld [vmem:[%s2326_s1 + $0xf0] ss:$8 sps:$4 sm:$0xff]   ;;  %v1699_v26 = vld [vmem:[#allocation5 + $0x28] sm:$0xff]   ;;  %s1957_s14 = smov [#allocation13]  }
  0x56   :  { %1471 = vmatprep.subr.bf16.mxu1 %v1696_v21  ;;  %v1700_v27 = vld [vmem:[#allocation5 + $0x60] sm:$0xff]   ;;  %v1702_v31 = vld [vmem:[#allocation5 + $0x58] sm:$0xff]   ;;  %v127_v46 = vld [vmem:[#allocation2 + $0x10] sm:$0xff]  ;;  %s1327_s15 = sshll.u32 %s1957_s14, 4  ;;  %s1328_s15 = int_to_ptr.vmem [resolvable:$true] %s1327_s15 }
  0x57   :  { %340 = vmatpush1.bf16.msra.mxu0 %v1654_v5  ;;  %v1673_v28 = vld [vmem:[%s2326_s1 + $0xe4] ss:$8 sps:$4 sm:$0xff]   ;;  %v1675_v30 = vld [vmem:[%s2326_s1 + $0xe0] ss:$8 sps:$4 sm:$0xff]   ;;  %v1676_v32 = vld [vmem:[%s2326_s1 + $0xd4] ss:$8 sps:$4 sm:$0xff]   ;;  %p1895_p3 = scmp.lt.s32.totalorder %s1328_s15, %s1328_s15 }
  0x58   :  { %341 = vmatprep.subr.bf16.mxu0 %v1655_v6  ;;  %v1701_v29 = vld [vmem:[#allocation5 + $0x20] sm:$0xff]   ;;  %v1703_v33 = vld [vmem:[#allocation5 + $0x18] sm:$0xff]   ;;  %v1704_v48 = vld [vmem:[#allocation5 + $0x50] sm:$0xff]   ;;  %s1890_s2 = scalar_lea.vmem %s1328_s15, 256 }
  0x59   :  { %1472 = vmatpush3.bf16.msra.mxu1 %v1697_v22  ;;  %v1678_v34 = vld [vmem:[%s2326_s1 + $0xd0] ss:$8 sps:$4 sm:$0xff]   ;;  %v1679_v35 = vld [vmem:[%s2326_s1 + $0xc4] ss:$8 sps:$4 sm:$0xff]   ;;  %v1681_v36 = vld [vmem:[%s2326_s1 + $0xc0] ss:$8 sps:$4 sm:$0xff]   ;;  %p1891_p2 = scmp.ne.s32.totalorder %s1328_s15, %s1890_s2  ;;  %p1896_p4 = scmp.lt.s32.totalorder %s1890_s2, %s1890_s2 }
  0x5a   :  { %1473 = vmatprep.subr.bf16.mxu1 %v1698_v23  ;;  %v1682_v37 = vld [vmem:[%s2326_s1 + $0xb4] ss:$8 sps:$4 sm:$0xff]   ;;  %v1684_v38 = vld [vmem:[%s2326_s1 + $0xb0] ss:$8 sps:$4 sm:$0xff]   ;;  %v1685_v39 = vld [vmem:[%s2326_s1 + $0xa4] ss:$8 sps:$4 sm:$0xff]  }
  0x5b   :  { %342 = vmatpush1.bf16.msra.mxu0 %v1657_v7  ;;  %v1687_v40 = vld [vmem:[%s2326_s1 + $0xa0] ss:$8 sps:$4 sm:$0xff]   ;;  %v1688_v41 = vld [vmem:[%s2326_s1 + $0x94] ss:$8 sps:$4 sm:$0xff]   ;;  %v1690_v42 = vld [vmem:[%s2326_s1 + $0x90] ss:$8 sps:$4 sm:$0xff]   ;;  %p1897_p5 = por %p1896_p4, %p1895_p3 }
  0x5c   :  { %343 = vmatprep.subr.bf16.mxu0 %v1658_v8  ;;  %v1691_v43 = vld [vmem:[%s2326_s1 + $0x84] ss:$8 sps:$4 sm:$0xff]   ;;  %v1693_v44 = vld [vmem:[%s2326_s1 + $0x80] ss:$8 sps:$4 sm:$0xff]   ;;  %v1705_v49 = vld [vmem:[#allocation5 + $0x10] sm:$0xff]  }
  0x5d   :  { %1474 = vmatpush3.bf16.msra.mxu1 %v1699_v26  ;;  %v125_v45 = vld [vmem:[#allocation2] sm:$0xff]  ;;  %v1706_v50 = vld [vmem:[#allocation5 + $0x48] sm:$0xff]   ;;  %v1710_v7 = vld [vmem:[%s2328_s3 + $0x38] sm:$0xff]   ;;  %p1898_p6 = pnand %p1897_p5, %p1891_p2 }
  0x5e   :  { %1475 = vmatprep.subr.bf16.mxu1 %v1700_v27  ;;  %v161_v47 = vpack.c.bf16 %v127_v46, %v125_v45  ;;  %v1707_v51 = vld [vmem:[#allocation5 + $0x8] sm:$0xff]   ;;  %v1708_v52 = vld [vmem:[#allocation5 + $0x40] sm:$0xff]   ;;  %v1715_v13 = vld [vmem:[%s2328_s3 + $0x10] sm:$0xff]  }
  0x5f   :  { %344 = vmatpush1.bf16.msra.mxu0 %v1660_v9  ;;  %v1709_v53 = vld [vmem:[#allocation5] sm:$0xff]   ;;  %v1711_v9 = vld [vmem:[%s2328_s3 + $0x30] sm:$0xff]   ;;  %v1716_v14 = vld [vmem:[%s2328_s3 + $0x8] sm:$0xff]  }
  0x60   :  { %345 = vmatprep.subr.bf16.mxu0 %v1661_v10  ;;  %v163_v60 = vld [vmem:[%s2335_s10] sm:$0x3]  ;;  %v1712_v10 = vld [vmem:[%s2328_s3 + $0x28] sm:$0xff]   ;;  %v1720_v18 = vld [vmem:[%s2329_s4 + $0x18] sm:$0xff]  }
  0x61   :  { %1476 = vmatpush3.bf16.msra.mxu1 %v1701_v29  ;;  %v172_v62 = vrot.slane %v163_v60, %v171_v57  ;;  %v168_v63 = vrot.slane %v163_v60, %v167_v58  ;;  %v1719_v17 = vld [vmem:[%s2329_s4 + $0x20] sm:$0xff]   ;;  %v1725_v45 = vld [vmem:[#allocation7 + $0x10] sm:$0xff]   ;;  %v1726_v46 = vld [vmem:[#allocation7 + $0x8] sm:$0xff]  }
  0x62   :  { %1477 = vmatprep.subr.bf16.mxu1 %v1702_v31  ;;  %v1390_v22 = vld [vmem:[%s2335_s10 + $0x2] ss:$0 sm:$0xff]  ;;  %v1721_v31 = vld [vmem:[%s2329_s4 + $0x10] sm:$0xff]  }
  0x63   :  { %346 = vmatpush1.bf16.msra.mxu0 %v1663_v11  ;;  %v1713_v11 = vld [vmem:[%s2328_s3 + $0x20] sm:$0xff]  }
  0x64   :  { %347 = vmatprep.subr.bf16.mxu0 %v1664_v12  ;;  %v1714_v12 = vld [vmem:[%s2328_s3 + $0x18] sm:$0xff]  }
  0x65   :  { %1478 = vmatpush3.bf16.msra.mxu1 %v1703_v33  ;;  %v1723_v33 = vld [vmem:[%s2329_s4] sm:$0xff]  }
  0x66   :  { %1479 = vmatprep.subr.bf16.mxu1 %v1704_v48  ;;  %v1416_v48 = vld [vmem:[%s2335_s10 + $0x4] ss:$0 sm:$0xff] }
  0x67   :  { %348 = vmatpush1.bf16.msra.mxu0 %v1666_v15  ;;  %v1717_v15 = vld [vmem:[%s2328_s3] sm:$0xff]  }
  0x68   :  { %349 = vmatprep.subr.bf16.mxu0 %v1667_v16  ;;  %v1718_v16 = vld [vmem:[%s2329_s4 + $0x28] sm:$0xff]  }
  0x69   :  { %1480 = vmatpush3.bf16.msra.mxu1 %v1705_v49 }
  0x6a   :  { %1481 = vmatprep.subr.bf16.mxu1 %v1706_v50 }
  0x6b   :  { %350 = vmatpush1.bf16.msra.mxu0 %v1669_v20 }
  0x6c   :  { %351 = vmatprep.subr.bf16.mxu0 %v1670_v24 }
  0x6d   :  { %1482 = vmatpush3.bf16.msra.mxu1 %v1707_v51 }
  0x6e   :  { %1483 = vmatprep.subr.bf16.mxu1 %v1708_v52 }
  0x6f   :  { %352 = vmatpush2.bf16.msra.mxu0 %v1672_v25 }
  0x70   :  { %353 = vmatprep.subr.bf16.mxu0 %v1673_v28 }
  0x71   :  { %1484 = vmatpush3.bf16.msra.mxu1 %v1709_v53 }
  0x72   :  { %1533 = vmatprep.subr.bf16.mxu1 %v1954_v54 }
  0x73   :  { %354 = vmatpush2.bf16.msra.mxu0 %v1675_v30 }
  0x74   :  { %355 = vmatprep.subr.bf16.mxu0 %v1676_v32  ;;  %v1722_v32 = vld [vmem:[%s2329_s4 + $0x8] sm:$0xff]  }
  0x77   :  { %356 = vmatpush2.bf16.msra.mxu0 %v1678_v34  ;;  %v1724_v34 = vld [vmem:[#allocation7 + $0x18] sm:$0xff]  }
  0x78   :  { %357 = vmatprep.subr.bf16.mxu0 %v1679_v35  ;;  %v1407_v35 = vld [vmem:[%s2335_s10 + $0x3] ss:$0 sm:$0xff] }
  0x7b   :  { %358 = vmatpush2.bf16.msra.mxu0 %v1681_v36 }
  0x7c   :  { %359 = vmatprep.subr.bf16.mxu0 %v1682_v37 }
  0x7f   :  { %360 = vmatpush2.bf16.msra.mxu0 %v1684_v38 }
  0x80   :  { %361 = vmatprep.subr.bf16.mxu0 %v1685_v39 }
  0x83   :  { %362 = vmatpush2.bf16.msra.mxu0 %v1687_v40 }
  0x84   :  { %363 = vmatprep.subr.bf16.mxu0 %v1688_v41 }
  0x87   :  { %364 = vmatpush2.bf16.msra.mxu0 %v1690_v42 }
  0x88   :  { %365 = vmatprep.subr.bf16.mxu0 %v1691_v43 }
  0x8b   :  { %366 = vmatpush2.bf16.msra.mxu0 %v1693_v44 }
  0x8c   :  { %1553 = vmatprep.subr.bf16.mxu0 %v1954_v54 }
  0x8e   :  { %368 = vmatmul.mubr.bf16.vlgmr.msra.gmra.mxu0 %v161_v47  ;;  %v1727_v47 = vld [vmem:[#allocation7] sm:$0xff]  }
  0x8f   :  { %1565 = vmatprep.mubr.msk.bf16.mxu0 %vm1955_vm0, %v1954_v54  ;;  %1554 = vmatpush3.bf16.msra.mxu0 %v1718_v16  ;;  %v1738_v16 = vld [vmem:[#allocation8 + $0x8] sm:$0xff]  }
  0x90   :  { %1555 = vmatprep.subr.bf16.mxu0 %v1954_v54 }
  0x93   :  { %1556 = vmatpush3.bf16.msra.mxu0 %v1719_v17  ;;  %v1739_v17 = vld [vmem:[#allocation8] sm:$0xff]  }
  0x94   :  { %1557 = vmatprep.subr.bf16.mxu0 %v1954_v54 }
  0x97   :  { %1558 = vmatpush3.bf16.msra.mxu0 %v1720_v18  ;;  %v1430_v18 = vld [vmem:[%s2335_s10 + $0x6] ss:$0 sm:$0xff] }
  0x98   :  { %1559 = vmatprep.subr.bf16.mxu0 %v1954_v54 }
  0x9b   :  { %1560 = vmatpush3.bf16.msra.mxu0 %v1721_v31  ;;  %v1743_v31 = vld [vmem:[#allocation10 + $0x10] sm:$0xff]  }
  0x9c   :  { %1561 = vmatprep.subr.bf16.mxu0 %v1954_v54 }
  0x9f   :  { %1562 = vmatpush3.bf16.msra.mxu0 %v1722_v32  ;;  %v1744_v32 = vld [vmem:[#allocation10 + $0x8] sm:$0xff]  }
  0xa0   :  { %1563 = vmatprep.subr.bf16.mxu0 %v1954_v54 }
  0xa3   :  { %1564 = vmatpush3.bf16.msra.mxu0 %v1723_v33  ;;  %v1745_v33 = vld [vmem:[#allocation10] sm:$0xff]  }
  0xa4   :  { %1601 = vmatprep.subr.bf16.mxu0 %v1954_v54 }
 0x14e   :  { %v369_v59 = vpop.f32.mrf.mxu0 }
 0x14f   :  { %v370_v5 = vadd.f32 %v369_v59, %v168_v63 }
 0x150   :  { %v371_v61 = vpop.f32.mrf.mxu0 }
 0x151   :  { %v372_v3 = vadd.f32 %v371_v61, %v172_v62  ;;  %v1728_v61 = vld [vmem:[%s2331_s6 + $0x38] sm:$0xff]  }
 0x152   :  { %v373_v0 = vpop.f32.mrf.mxu0 }
 0x153   :  { %v374_v1 = vadd.f32 %v373_v0, %v168_v63  ;;  %v1729_v63 = vld [vmem:[%s2331_s6 + $0x30] sm:$0xff]   ;;  %v1730_v0 = vld [vmem:[%s2331_s6 + $0x28] sm:$0xff]  }
 0x154   :  { %v375_v2 = vpop.f32.mrf.mxu0 }
 0x155   :  { %v376_v4 = vadd.f32 %v375_v2, %v172_v62  ;;  %v410_v8 = vpack.c.bf16 %v374_v1, %v370_v5  ;;  %v1731_v1 = vld [vmem:[%s2331_s6 + $0x20] sm:$0xff]   ;;  %v1732_v2 = vld [vmem:[%s2331_s6 + $0x18] sm:$0xff]  }
 0x156   :  { %v1735_v5 = vld [vmem:[%s2331_s6] sm:$0xff]  }
 0x157   :  { %v411_v6 = vpack.c.bf16 %v376_v4, %v372_v3  ;;  %v1733_v3 = vld [vmem:[%s2331_s6 + $0x10] sm:$0xff]   ;;  %v1734_v4 = vld [vmem:[%s2331_s6 + $0x8] sm:$0xff]  }
 0x159   :  { %547 = vmatprep.mubr.bf16.mxu1 %v411_v6  ;;  %v1736_v6 = vld [vmem:[#allocation8 + $0x18] sm:$0xff]  }
 0x15a   :  { %548 = vmatmul.mubr.bf16.vlgmr.msra.gmra.mxu1 %v410_v8 }
 0x15b   :  { %1534 = vmatpush3.bf16.msra.mxu1 %v1710_v7  ;;  %1549 = vmatprep.mubr.msk.bf16.mxu1 %vm1955_vm0, %v1954_v54  ;;  %v1424_v7 = vld [vmem:[%s2335_s10 + $0x5] ss:$0 sm:$0xff] }
 0x15c   :  { %1535 = vmatprep.subr.bf16.mxu1 %v1954_v54 }
 0x15f   :  { %1536 = vmatpush3.bf16.msra.mxu1 %v1711_v9 }
 0x160   :  { %1537 = vmatprep.subr.bf16.mxu1 %v1954_v54 }
 0x163   :  { %1538 = vmatpush3.bf16.msra.mxu1 %v1712_v10 }
 0x164   :  { %1539 = vmatprep.subr.bf16.mxu1 %v1954_v54 }
 0x167   :  { %1540 = vmatpush3.bf16.msra.mxu1 %v1713_v11 }
 0x168   :  { %1541 = vmatprep.subr.bf16.mxu1 %v1954_v54 }
 0x16b   :  { %1542 = vmatpush3.bf16.msra.mxu1 %v1714_v12 }
 0x16c   :  { %1543 = vmatprep.subr.bf16.mxu1 %v1954_v54 }
 0x16f   :  { %1544 = vmatpush3.bf16.msra.mxu1 %v1715_v13 }
 0x170   :  { %1545 = vmatprep.subr.bf16.mxu1 %v1954_v54 }
 0x173   :  { %1546 = vmatpush3.bf16.msra.mxu1 %v1716_v14 }
 0x174   :  { %1547 = vmatprep.subr.bf16.mxu1 %v1954_v54 }
 0x177   :  { %1548 = vmatpush3.bf16.msra.mxu1 %v1717_v15  ;;  %v1737_v15 = vld [vmem:[#allocation8 + $0x10] sm:$0xff]  }
 0x178   :  { %1569 = vmatprep.subr.bf16.mxu1 %v1954_v54 }
 0x21a   :  { %v1485_v19 = vpop.f32.mrf.mxu1 }
 0x21c   :  { %v1486_v20 = vpop.f32.mrf.mxu1 }
 0x21d   :  { %v1487_v21 = vadd.f32 %v1486_v20, %v1485_v19 }
 0x21e   :  { %v1488_v23 = vpop.f32.mrf.mxu1 }
 0x21f   :  { %v550_v25 = vadd.f32 %v1487_v21, %v1390_v22 }
 0x220   :  { %v1489_v24 = vpop.f32.mrf.mxu1 }
 0x221   :  { %v1490_v26 = vadd.f32 %v1489_v24, %v1488_v23  ;;  %v556_v28 = vmax.f32 %v550_v25, 0.0 }
 0x223   :  { %v553_v27 = vadd.f32 %v1490_v26, %v1390_v22 }
 0x225   :  { %v557_v29 = vmax.f32 %v553_v27, 0.0  ;;  %v1740_v27 = vld [vmem:[#allocation10 + $0x28] sm:$0xff]  }
 0x227   :  { %v558_v30 = vpack.c.bf16 %v557_v29, %v556_v28  ;;  %v1741_v29 = vld [vmem:[#allocation10 + $0x20] sm:$0xff]  }
 0x229   :  { %1550 = vmatmul.mubr.bf16.vlgmr.msra.gmra.mxu1 %v558_v30  ;;  %v1742_v30 = vld [vmem:[#allocation10 + $0x18] sm:$0xff]  }
 0x22a   :  { %1577 = vmatprep.mubr.msk.bf16.mxu1 %vm1955_vm0, %v1954_v54  ;;  %1570 = vmatpush3.bf16.msra.mxu1 %v1724_v34  ;;  %v1746_v34 = vld [vmem:[#allocation11 + $0x70] ss:$8 sps:$4 sm:$0xff]  }
 0x22b   :  { %1571 = vmatprep.subr.bf16.mxu1 %v1954_v54 }
 0x22e   :  { %1572 = vmatpush3.bf16.msra.mxu1 %v1725_v45  ;;  %v1439_v45 = vld [vmem:[%s2335_s10 + $0x7] ss:$0 sm:$0xff] }
 0x22f   :  { %1573 = vmatprep.subr.bf16.mxu1 %v1954_v54 }
 0x232   :  { %1574 = vmatpush3.bf16.msra.mxu1 %v1726_v46 }
 0x233   :  { %1575 = vmatprep.subr.bf16.mxu1 %v1954_v54 }
 0x236   :  { %1576 = vmatpush3.bf16.msra.mxu1 %v1727_v47 }
 0x237   :  { %1581 = vmatprep.subr.bf16.mxu1 %v1954_v54 }
 0x2e9   :  { %v664_v36 = vpop.f32.mrf.mxu1 }
 0x2ea   :  { %v665_v38 = vadd.f32 %v1407_v35, %v664_v36  ;;  %v1751_v36 = vld [vmem:[#allocation11 + $0x64] ss:$8 sps:$4 sm:$0xff]  }
 0x2eb   :  { %v1551_v37 = vpop.f32.mrf.mxu1 }
 0x2ec   :  { %v671_v42 = vmax.f32 %v665_v38, 0.0  ;;  %v1749_v37 = vld [vmem:[#allocation11 + $0x60] ss:$8 sps:$4 sm:$0xff]   ;;  %v1754_v38 = vld [vmem:[#allocation11 + $0x54] ss:$8 sps:$4 sm:$0xff]  }
 0x2ed   :  { %v667_v39 = vpop.f32.mrf.mxu1 }
 0x2ee   :  { %v668_v40 = vadd.f32 %v1407_v35, %v667_v39  ;;  %v1748_v35 = vld [vmem:[#allocation11 + $0x74] ss:$8 sps:$4 sm:$0xff]   ;;  %v1752_v39 = vld [vmem:[#allocation11 + $0x50] ss:$8 sps:$4 sm:$0xff]  }
 0x2ef   :  { %v1552_v41 = vpop.f32.mrf.mxu1 }
 0x2f0   :  { %v672_v43 = vmax.f32 %v668_v40, 0.0  ;;  %v1757_v40 = vld [vmem:[#allocation11 + $0x44] ss:$8 sps:$4 sm:$0xff]   ;;  %v1755_v41 = vld [vmem:[#allocation11 + $0x40] ss:$8 sps:$4 sm:$0xff]  }
 0x2f2   :  { %v673_v44 = vpack.c.bf16 %v672_v43, %v671_v42  ;;  %v1760_v42 = vld [vmem:[#allocation11 + $0x34] ss:$8 sps:$4 sm:$0xff]   ;;  %v1763_v43 = vld [vmem:[#allocation11 + $0x24] ss:$8 sps:$4 sm:$0xff]  }
 0x2f4   :  { %1566 = vmatmul.mubr.msk.bf16.vlgmr.msra.gmra.mxu0 %vm729_vm1, %v673_v44  ;;  %v1761_v44 = vld [vmem:[#allocation11 + $0x20] ss:$8 sps:$4 sm:$0xff]  }
 0x2f5   :  { %1609 = vmatprep.mubr.msk.bf16.mxu0 %vm1955_vm0, %v1954_v54  ;;  %1602 = vmatpush3.bf16.msra.mxu0 %v1736_v6 }
 0x2f6   :  { %1603 = vmatprep.subr.bf16.mxu0 %v1954_v54 }
 0x2f9   :  { %1604 = vmatpush3.bf16.msra.mxu0 %v1737_v15 }
 0x2fa   :  { %1605 = vmatprep.subr.bf16.mxu0 %v1954_v54 }
 0x2fd   :  { %1606 = vmatpush3.bf16.msra.mxu0 %v1738_v16 }
 0x2fe   :  { %1607 = vmatprep.subr.bf16.mxu0 %v1954_v54 }
 0x301   :  { %1608 = vmatpush3.bf16.msra.mxu0 %v1739_v17 }
 0x302   :  { %1613 = vmatprep.subr.bf16.mxu0 %v1954_v54 }
 0x3b4   :  { %v767_v49 = vpop.f32.mrf.mxu0 }
 0x3b5   :  { %v768_v51 = vadd.f32 %v1416_v48, %v767_v49 }
 0x3b6   :  { %v1567_v50 = vpop.f32.mrf.mxu0 }
 0x3b7   :  { %v774_v59 = vmax.f32 %v768_v51, 0.0 }
 0x3b8   :  { %v770_v52 = vpop.f32.mrf.mxu0 }
 0x3b9   :  { %v771_v53 = vadd.f32 %v1416_v48, %v770_v52 }
 0x3ba   :  { %v1568_v55 = vpop.f32.mrf.mxu0 }
 0x3bb   :  { %v775_v60 = vmax.f32 %v771_v53, 0.0 }
 0x3bd   :  { %v776_v62 = vpack.c.bf16 %v775_v60, %v774_v59  ;;  %v1766_v59 = vld [vmem:[#allocation11 + $0x14] ss:$8 sps:$4 sm:$0xff]   ;;  %v1764_v60 = vld [vmem:[#allocation11 + $0x10] ss:$8 sps:$4 sm:$0xff]  }
 0x3bf   :  { %1578 = vmatmul.mubr.msk.bf16.vlgmr.msra.gmra.mxu1 %vm816_vm2, %v776_v62  ;;  %v1767_v62 = vld [vmem:[#allocation11] ss:$8 sps:$4 sm:$0xff]  }
 0x3c0   :  { %1582 = vmatpush3.bf16.msra.mxu1 %v1728_v61  ;;  %1597 = vmatprep.mubr.msk.bf16.mxu1 %vm1955_vm0, %v1954_v54  ;;  %v1769_v61 = vld [vmem:[#allocation11 + $0x4] ss:$8 sps:$4 sm:$0xff]  }
 0x3c1   :  { %1583 = vmatprep.subr.bf16.mxu1 %v1954_v54 }
 0x3c4   :  { %1584 = vmatpush3.bf16.msra.mxu1 %v1729_v63  ;;  %v1956_v63 = vmov 0  }
 0x3c5   :  { %1585 = vmatprep.subr.bf16.mxu1 %v1954_v54 }
 0x3c8   :  { %1586 = vmatpush3.bf16.msra.mxu1 %v1730_v0  ;;  %v1445_v0 = vld [vmem:[%s2335_s10 + $0x8] ss:$0 sm:$0xff] }
 0x3c9   :  { %1587 = vmatprep.subr.bf16.mxu1 %v1954_v54 }
 0x3cc   :  { %1588 = vmatpush3.bf16.msra.mxu1 %v1731_v1 }
 0x3cd   :  { %1589 = vmatprep.subr.bf16.mxu1 %v1954_v54 }
 0x3d0   :  { %1590 = vmatpush3.bf16.msra.mxu1 %v1732_v2 }
 0x3d1   :  { %1591 = vmatprep.subr.bf16.mxu1 %v1954_v54 }
 0x3d4   :  { %1592 = vmatpush3.bf16.msra.mxu1 %v1733_v3 }
 0x3d5   :  { %1593 = vmatprep.subr.bf16.mxu1 %v1954_v54 }
 0x3d8   :  { %1594 = vmatpush3.bf16.msra.mxu1 %v1734_v4 }
 0x3d9   :  { %1595 = vmatprep.subr.bf16.mxu1 %v1954_v54 }
 0x3dc   :  { %1596 = vmatpush3.bf16.msra.mxu1 %v1735_v5 }
 0x3dd   :  { %1275 = vmatprep.subr.bf16.mxu1 %v1748_v35 }
 0x47f   :  { %v854_v8 = vpop.f32.mrf.mxu1 }
 0x480   :  { %v855_v9 = vadd.f32 %v1424_v7, %v854_v8 }
 0x481   :  { %v1579_v10 = vpop.f32.mrf.mxu1 }
 0x482   :  { %861 = vst [vmem:[#allocation13] sm:$0xff] %v855_v9 }
 0x483   :  { %v857_v11 = vpop.f32.mrf.mxu1 }
 0x484   :  { %v858_v12 = vadd.f32 %v1424_v7, %v857_v11 }
 0x485   :  { %v1580_v13 = vpop.f32.mrf.mxu1 }
 0x486   :  { %862 = vst [vmem:[#allocation13 + $0x8] sm:$0xff] %v858_v12  ;;  %v879_v14 = vpack.c.bf16 %v858_v12, %v855_v9 }
 0x488   :  { %1598 = vmatmul.mubr.bf16.vlgmr.msra.gmra.mxu1 %v879_v14 }
 0x489   :  { %1276 = vmatpush1.bf16.msra.mxu1 %v1746_v34  ;;  %1307 = vmatprep.mubr.bf16.mxu1 %v1956_v63 }
 0x48a   :  { %1277 = vmatprep.subr.bf16.mxu1 %v1751_v36 }
 0x48d   :  { %1278 = vmatpush1.bf16.msra.mxu1 %v1749_v37 }
 0x48e   :  { %1279 = vmatprep.subr.bf16.mxu1 %v1754_v38 }
 0x491   :  { %1280 = vmatpush1.bf16.msra.mxu1 %v1752_v39 }
 0x492   :  { %1281 = vmatprep.subr.bf16.mxu1 %v1757_v40 }
 0x495   :  { %1282 = vmatpush1.bf16.msra.mxu1 %v1755_v41 }
 0x496   :  { %1283 = vmatprep.subr.bf16.mxu1 %v1760_v42 }
 0x548   :  { %v969_v19 = vpop.f32.mrf.mxu1 }
 0x549   :  { %v970_v21 = vadd.f32 %v1430_v18, %v969_v19 }
 0x54a   :  { %v1599_v20 = vpop.f32.mrf.mxu1 }
 0x54b   :  { %v976_v25 = vmax.f32 %v970_v21, 0.0 }
 0x54c   :  { %v972_v22 = vpop.f32.mrf.mxu1 }
 0x54d   :  { %v973_v23 = vadd.f32 %v1430_v18, %v972_v22 }
 0x54e   :  { %v1600_v24 = vpop.f32.mrf.mxu1 }
 0x54f   :  { %v977_v26 = vmax.f32 %v973_v23, 0.0 }
 0x551   :  { %v978_v28 = vpack.c.bf16 %v977_v26, %v976_v25 }
 0x553   :  { %1610 = vmatmul.mubr.msk.bf16.vlgmr.msra.gmra.mxu0 %vm816_vm2, %v978_v28 }
 0x554   :  { %1614 = vmatpush3.bf16.msra.mxu0 %v1740_v27  ;;  %1625 = vmatprep.mubr.msk.bf16.mxu0 %vm1955_vm0, %v1954_v54 }
 0x555   :  { %1615 = vmatprep.subr.bf16.mxu0 %v1954_v54 }
 0x558   :  { %1616 = vmatpush3.bf16.msra.mxu0 %v1741_v29 }
 0x559   :  { %1617 = vmatprep.subr.bf16.mxu0 %v1954_v54 }
 0x55c   :  { %1618 = vmatpush3.bf16.msra.mxu0 %v1742_v30 }
 0x55d   :  { %1619 = vmatprep.subr.bf16.mxu0 %v1954_v54 }
 0x560   :  { %1620 = vmatpush3.bf16.msra.mxu0 %v1743_v31 }
 0x561   :  { %1621 = vmatprep.subr.bf16.mxu0 %v1954_v54 }
 0x564   :  { %1622 = vmatpush3.bf16.msra.mxu0 %v1744_v32 }
 0x565   :  { %1623 = vmatprep.subr.bf16.mxu0 %v1954_v54  ;;  %v1758_v54 = vld [vmem:[#allocation11 + $0x30] ss:$8 sps:$4 sm:$0xff]  }
 0x566   :  { %1284 = vmatpush1.bf16.msra.mxu1 %v1758_v54 }
 0x567   :  { %1285 = vmatprep.subr.bf16.mxu1 %v1763_v43 }
 0x568   :  { %1624 = vmatpush3.bf16.msra.mxu0 %v1745_v33 }
 0x56a   :  { %1286 = vmatpush1.bf16.msra.mxu1 %v1761_v44 }
 0x56b   :  { %1287 = vmatprep.subr.bf16.mxu1 %v1766_v59 }
 0x56e   :  { %1288 = vmatpush1.bf16.msra.mxu1 %v1764_v60 }
 0x56f   :  { %1289 = vmatprep.subr.bf16.mxu1 %v1769_v61 }
 0x572   :  { %1290 = vmatpush1.bf16.msra.mxu1 %v1767_v62 }
 0x613   :  { %v1055_v46 = vpop.f32.mrf.mxu0 }
 0x614   :  { %v1056_v48 = vadd.f32 %v1439_v45, %v1055_v46 }
 0x615   :  { %v1611_v47 = vpop.f32.mrf.mxu0 }
 0x616   :  { %v1062_v52 = vmax.f32 %v1056_v48, 0.0 }
 0x617   :  { %v1058_v49 = vpop.f32.mrf.mxu0 }
 0x618   :  { %v1059_v50 = vadd.f32 %v1439_v45, %v1058_v49 }
 0x619   :  { %v1612_v51 = vpop.f32.mrf.mxu0 }
 0x61a   :  { %v1063_v53 = vmax.f32 %v1059_v50, 0.0 }
 0x61c   :  { %v1064_v55 = vpack.c.bf16 %v1063_v53, %v1062_v52 }
 0x61e   :  { %1626 = vmatmul.mubr.msk.bf16.vlgmr.msra.gmra.mxu0 %vm729_vm1, %v1064_v55 }
 0x6de   :  { %v1157_v1 = vpop.f32.mrf.mxu0 }
 0x6df   :  { %v1158_v3 = vadd.f32 %v1445_v0, %v1157_v1 }
 0x6e0   :  { %v1627_v2 = vpop.f32.mrf.mxu0 }
 0x6e1   :  { %v1164_v7 = vmax.f32 %v1158_v3, 0.0 }
 0x6e2   :  { %v1160_v4 = vpop.f32.mrf.mxu0 }
 0x6e3   :  { %v1161_v5 = vadd.f32 %v1445_v0, %v1160_v4 }
 0x6e4   :  { %v1628_v6 = vpop.f32.mrf.mxu0 }
 0x6e5   :  { %v1165_v8 = vmax.f32 %v1161_v5, 0.0 }
 0x6e7   :  { %v1166_v9 = vpack.c.bf16 %v1165_v8, %v1164_v7 }
 0x6e9   :  { %1308 = vmatmul.mubr.bf16.vlgmr.msra.gmra.mxu1 %v1166_v9 }
 0x6ea   :  { %1901 = shalt.err (!%p1898_p6)
}
 0x6eb   :  { %1333 = dma.vmem_to_hbm [thread:$0]  %s1328_s15, 256, %s2336_s11, [#allocation4], %s1952_s5, %s1952_s5, %s1953_s16  }
 0x6ec   :  { %v1183_v10 = vld [vmem:[%s2335_s10 + $0x9] sm:$0x3]  ;;  %s1958_s20 = smov [#allocation14]  }
 0x6ed   :  { %v1188_v11 = vrot.slane %v1183_v10, %v167_v58  ;;  %v1192_v12 = vrot.slane %v1183_v10, %v171_v57  ;;  %s1339_s1 = sshll.u32 %s1958_s20, 4  ;;  %s1340_s1 = int_to_ptr.vmem [resolvable:$true] %s1339_s1 }
 0x6ee   :  { %s1910_s10 = scalar_lea.vmem %s1340_s1, 512  ;;  %p1915_p8 = scmp.lt.s32.totalorder %s1340_s1, %s1340_s1 }
 0x6ef   :  { %p1911_p7 = scmp.ne.s32.totalorder %s1340_s1, %s1910_s10  ;;  %p1916_p9 = scmp.lt.s32.totalorder %s1910_s10, %s1910_s10 }
 0x6f1   :  { %p1917_p10 = por %p1916_p9, %p1915_p8 }
 0x6f3   :  { %p1918_p11 = pnand %p1917_p10, %p1911_p7 }
 0x7a9   :  { %v1309_v13 = vpop.f32.mrf.mxu1 }
 0x7aa   :  { %v1310_v14 = vadd.f32 %v1309_v13, %v1188_v11 }
 0x7ab   :  { %v1311_v15 = vpop.f32.mrf.mxu1 }
 0x7ac   :  { %1318 = vst [vmem:[#allocation14] sm:$0xff] %v1310_v14  ;;  %v1312_v16 = vadd.f32 %v1311_v15, %v1192_v12 }
 0x7ad   :  { %v1313_v17 = vpop.f32.mrf.mxu1 }
 0x7ae   :  { %1319 = vst [vmem:[#allocation14 + $0x8] sm:$0xff] %v1312_v16  ;;  %v1314_v18 = vadd.f32 %v1313_v17, %v1188_v11 }
 0x7af   :  { %v1315_v19 = vpop.f32.mrf.mxu1 }
 0x7b0   :  { %1320 = vst [vmem:[#allocation14 + $0x10] sm:$0xff] %v1314_v18  ;;  %v1316_v20 = vadd.f32 %v1315_v19, %v1192_v12 }
 0x7b2   :  { %1321 = vst [vmem:[#allocation14 + $0x18] sm:$0xff] %v1316_v20 }
 0x7b3   :  { %1921 = shalt.err (!%p1918_p11)
}
 0x7b4   :  { %1345 = dma.vmem_to_hbm [thread:$0]  %s1340_s1, 512, %s2337_s12, [#allocation15], %s1947_s17, %s1947_s17, %s1948_s18  }
 0x7b5   :  { %1938 = dma.done.wait [#allocation4], 256  }
 0x7b6   :  { %1939 = vsyncadd [#allocation4], 4294967040 }
 0x7b7   :  { %1940 = dma.done.wait [#allocation15], 512  }
 0x7b8   :  { %1941 = vsyncadd [#allocation15], 4294966784 }
 0x7b9   :  { %1352 = vsyncpa [#allocation3], 1 }
 0x7ba   :  { %1353 = vsyncpa [#allocation6], 1 }
 0x7bb   :  { %1354 = vsyncpa [#allocation9], 1 }
 0x7bc   :  { %1355 = vsyncpa [#allocation12], 1 }
 0x7bd   :  { %1356 = vsyncpa [#allocation4], 1 }
 0x7be   :  { %1357 = vsyncpa [#allocation15], 1 }

</bundles_post_ra>
